<compile_context>
chip_gen: v7x
topology: tpu7x:2x2x1
jax: 0.10.0
libtpu: 0.0.40
codegen_flags: <defaults>
</compile_context>

<pallas_src>
import math

import jax
import jax.numpy as jnp
from jax import lax
from jax.experimental import pallas as pl
from jax.experimental.pallas import tpu as pltpu

# ---- Giles (2010) single-precision erfinv coefficients (division-free) --------------
_GILES_CENTRAL = (2.81022636e-08, 3.43273939e-07, -3.5233877e-06, -4.39150654e-06,
                  2.1858087e-04, -1.25372503e-03, -4.17768164e-03, 2.46640727e-01,
                  1.50140941e+00)
_GILES_TAIL = (-2.00214257e-04, 1.00950558e-04, 1.34934322e-03, -3.67342844e-03,
               5.73950773e-03, -7.6224613e-03, 9.43887047e-03, 1.00167406e+00,
               2.83297682e+00)
_SQRT2 = 1.4142135623730951

_LANE_CANDIDATES = (512, 256, 128)
_TILE_ROW_CANDIDATES = (2048, 1024, 512, 256, 128, 64, 32, 16, 8)
_SINGLE_BLOCK_BYTES = 4 << 20          # per-buffer cap for the full-array-block fallback

# Older jax versions may not export CORE_PARALLEL; fall back to plain "parallel".
_CORE_PARALLEL = getattr(pltpu, "CORE_PARALLEL", "parallel")


def _horner(coefs, x):
    acc = jnp.float32(coefs[0])
    for c in coefs[1:]:
        acc = acc * x + jnp.float32(c)
    return acc


def _normal_from_index(idx, seed):
    """int32 element counter + int32 seed -> f32 N(0,1). Portable jnp/lax ops only."""
    # --- 32-bit counter hash: Weyl step + Murmur3 fmix32 finalizer (wraps mod 2^32). ---
    # (Signed constants are the two's-complement views of the usual unsigned ones.)
    x = idx * jnp.int32(-1640531535) + seed * jnp.int32(1013904223) + jnp.int32(362437)
    x = x ^ ((x >> 16) & jnp.int32(0x0000FFFF))      # (>>k)&mask == logical shift right
    x = x * jnp.int32(-2048144789)                   # 0x85EBCA6B
    x = x ^ ((x >> 13) & jnp.int32(0x0007FFFF))
    x = x * jnp.int32(-1028477387)                   # 0xC2B2AE35
    x = x ^ ((x >> 16) & jnp.int32(0x0000FFFF))
    # --- 23 mantissa bits -> t = 2u - 1 with u in the OPEN interval (0,1). ---
    m = (x & jnp.int32(0x007FFFFF)).astype(jnp.float32)
    t = m * jnp.float32(2.0 ** -22) + jnp.float32(2.0 ** -23 - 1.0)
    # --- z = sqrt(2) * erfinv(t): division-free Giles approximation. Both branches are
    # always finite (w >= 0), so the discarded side of the where never yields inf/NaN.
    w = -jnp.log((1.0 - t) * (1.0 + t))
    p_central = _horner(_GILES_CENTRAL, w - 2.5)
    p_tail = _horner(_GILES_TAIL, jnp.sqrt(w) - 3.0)
    p = jnp.where(w < 5.0, p_central, p_tail)
    return p * (t * jnp.float32(_SQRT2))


def _normal_noise_kernel(seed_ref, o_ref):
    block_rows, lane = o_ref.shape
    seed = seed_ref[0]
    # Global element offset of this block (unique per grid index -> deterministic and
    # independent of which TensorCore runs the block).
    # TODO(synk): int32 counters wrap above 2^31 elements; fine for noise injection.
    block_base = pl.program_id(0) * (block_rows * lane)

    # Strip-mine so the ~6-8 live full-tile temporaries stay in vregs (no VMEM spills).
    natural = max(8, 32 // jnp.dtype(o_ref.dtype).itemsize)   # 8 f32 / 16 bf16 / 32 int8
    if block_rows % natural == 0 and block_rows > natural:
        strip = natural
    else:
        strip = block_rows
    n_strips = block_rows // strip

    # Per-strip local element offsets, hoisted so the iota/mul is emitted once.
    local = (lax.broadcasted_iota(jnp.int32, (strip, lane), 0) * jnp.int32(lane)
             + lax.broadcasted_iota(jnp.int32, (strip, lane), 1))

    if n_strips == 1:
        o_ref[...] = _normal_from_index(local + block_base, seed).astype(o_ref.dtype)
    else:
        def body(s, carry):
            base = block_base + s * (strip * lane)
            z = _normal_from_index(local + base, seed)
            o_ref[pl.ds(s * strip, strip), :] = z.astype(o_ref.dtype)
            return carry
        lax.fori_loop(0, n_strips, body, 0)


def _plan_layout(total, dtype):
    """Pick (lane, tile_rows, padded_rows). Whenever total % 128 == 0 we guarantee
    padded_rows * lane == total, so the final reshape is metadata-only (no HBM copy)."""
    itemsize = jnp.dtype(dtype).itemsize
    min_rows = max(8, 32 // itemsize)              # sublane packing granularity

    for lane in _LANE_CANDIDATES:
        if total % lane:
            continue
        rows = total // lane
        tile_rows = None
        for tr in _TILE_ROW_CANDIDATES:
            if tr >= min_rows and rows % tr == 0 and rows // tr >= 2:
                tile_rows = tr
                break
        if tile_rows is not None:
            # Prefer an even block count so a core-parallel grid balances on v7x's 2 TCs.
            if (rows // tile_rows) % 2 and tile_rows // 2 >= min_rows:
                tile_rows //= 2
            return lane, tile_rows, rows
        if rows * lane * itemsize <= _SINGLE_BLOCK_BYTES:
            return lane, rows, rows                # single full-array block, still copy-free
    # Awkward totals (not a multiple of 128): padded slab + one post-kernel slice.
    lane = 128
    rows = pl.cdiv(total, lane)
    if rows * lane * itemsize <= _SINGLE_BLOCK_BYTES:
        return lane, rows, rows
    tile_rows = 512
    return lane, tile_rows, pl.cdiv(rows, tile_rows) * tile_rows


def pallas_normal(shape, dtype=jnp.float32, seed=0):
    """Standard-normal noise of `shape`/`dtype`, generated by a Pallas TPU kernel."""
    shape = tuple(int(d) for d in shape)
    total = math.prod(shape) if shape else 1
    if total == 0:
        return jnp.zeros(shape, dtype)

    lane, tile_rows, padded_rows = _plan_layout(total, dtype)
    num_blocks = padded_rows // tile_rows

    # Shard blocks across v7x's two TensorCores when there is enough (even) work; the
    # per-element counter hashing makes the result independent of core assignment.
    if num_blocks > 1 and num_blocks % 2 == 0:
        semantics = (_CORE_PARALLEL,)
    else:
        semantics = ("parallel",)

    seed_arr = jnp.asarray([seed], dtype=jnp.int32)

    out2d = pl.pallas_call(
        _normal_noise_kernel,
        out_shape=jax.ShapeDtypeStruct((padded_rows, lane), dtype),
        grid_spec=pltpu.PrefetchScalarGridSpec(
            num_scalar_prefetch=1,                 # seed lives in SMEM
            grid=(num_blocks,),
            in_specs=[],
            out_specs=pl.BlockSpec((tile_rows, lane), lambda i, seed_ref: (i, 0)),
        ),
        compiler_params=pltpu.CompilerParams(dimension_semantics=semantics),
    )(seed_arr)

    if padded_rows * lane == total:
        return out2d.reshape(shape)                # metadata-only, no post-kernel copy
    # TODO(synk): tiny/awkward totals (e.g. the dim= branch) still pay a slice copy and
    # launch overhead; a jax.random.normal bypass would be cheaper, but the Pallas path
    # is kept so the kernel is always exercised.
    return out2d.reshape(-1)[:total].reshape(shape)


class NormalNoise:
    """JAX/Pallas port of konfai NormalNoise: forward ignores the input values and
    returns standard-normal noise (shaped like the input, or (dim,) when dim is set)."""

    def __init__(self, dim=None):
        self.dim = dim

    def __call__(self, x, seed=0):
        if self.dim is not None:
            return pallas_normal((self.dim,), jnp.float32, seed)   # torch.randn(dim)
        return pallas_normal(x.shape, x.dtype, seed)               # torch.randn_like


if __name__ == "__main__":
    key = jax.random.PRNGKey(0)
    shape = (2, 4, 16, 16)                         # NCHW, as the module is used on images
    x = jax.random.normal(key, shape, dtype=jnp.float32)

    noise_mod = NormalNoise()
    n0 = jax.block_until_ready(noise_mod(x, seed=0))
    n0b = jax.block_until_ready(noise_mod(x, seed=0))
    n1 = jax.block_until_ready(noise_mod(x, seed=1))

    assert n0.shape == x.shape and n0.dtype == x.dtype
    assert bool(jnp.all(jnp.isfinite(n0)))
    assert bool(jnp.array_equal(n0, n0b)), "same seed must reproduce the same noise"
    assert not bool(jnp.array_equal(n0, n1)), "different seeds must give different noise"
    mean = float(jnp.mean(n0))
    std = float(jnp.std(n0))
    assert abs(mean) < 0.15 and 0.8 < std < 1.2, (mean, std)

    # dim-branch (torch.randn(dim)) and a non-f32 dtype.
    n_dim = jax.block_until_ready(NormalNoise(dim=32)(x))
    assert n_dim.shape == (32,) and n_dim.dtype == jnp.float32

    n_bf16 = jax.block_until_ready(noise_mod(x.astype(jnp.bfloat16), seed=3))
    assert n_bf16.shape == shape and n_bf16.dtype == jnp.bfloat16
    assert bool(jnp.all(jnp.isfinite(n_bf16.astype(jnp.float32))))

    print("KERNEL_OK")
</pallas_src>

<mosaic_0001>
module attributes {stable_mosaic.version = 11 : i64} {
  func.func @_normal_noise_kernel(%arg0: i32, %arg1: memref<1xi32, #tpu.memory_space<smem>>, %arg2: memref<4x512xf32, #tpu.memory_space<vmem>>) attributes {dimension_semantics = [#tpu.dimension_semantics<parallel>], iteration_bounds = array<i64: 1>, scalar_prefetch = 1 : i64, scratch_operands = 0 : i64, tpu.core_type = #tpu.core_type<tc>, window_params = [{transform_indices = @transform_0, window_bounds = array<i64: 4, 512>}]} {
    %c0 = arith.constant 0 : index
    %0 = memref.load %arg1[%c0] : memref<1xi32, #tpu.memory_space<smem>>
    %c2048_i32 = arith.constant 2048 : i32
    %1 = arith.muli %arg0, %c2048_i32 : i32
    %2 = tpu.iota {dimensions = array<i32: 0>} : vector<4x512xi32>
    %c512_i32 = arith.constant 512 : i32
    %3 = vector.broadcast %c512_i32 : i32 to vector<4x512xi32>
    %4 = arith.muli %2, %3 : vector<4x512xi32>
    %5 = tpu.iota {dimensions = array<i32: 1>} : vector<4x512xi32>
    %6 = arith.addi %4, %5 : vector<4x512xi32>
    %7 = vector.broadcast %1 : i32 to vector<4x512xi32>
    %8 = arith.addi %6, %7 : vector<4x512xi32>
    %c-1640531535_i32 = arith.constant -1640531535 : i32
    %9 = vector.broadcast %c-1640531535_i32 : i32 to vector<4x512xi32>
    %10 = arith.muli %8, %9 : vector<4x512xi32>
    %c1013904223_i32 = arith.constant 1013904223 : i32
    %11 = arith.muli %0, %c1013904223_i32 : i32
    %12 = vector.broadcast %11 : i32 to vector<4x512xi32>
    %13 = arith.addi %10, %12 : vector<4x512xi32>
    %c362437_i32 = arith.constant 362437 : i32
    %14 = vector.broadcast %c362437_i32 : i32 to vector<4x512xi32>
    %15 = arith.addi %13, %14 : vector<4x512xi32>
    %c16_i32 = arith.constant 16 : i32
    %16 = vector.broadcast %c16_i32 : i32 to vector<4x512xi32>
    %17 = arith.shrsi %15, %16 : vector<4x512xi32>
    %c65535_i32 = arith.constant 65535 : i32
    %18 = vector.broadcast %c65535_i32 : i32 to vector<4x512xi32>
    %19 = arith.andi %17, %18 : vector<4x512xi32>
    %20 = arith.xori %15, %19 : vector<4x512xi32>
    %c-2048144789_i32 = arith.constant -2048144789 : i32
    %21 = vector.broadcast %c-2048144789_i32 : i32 to vector<4x512xi32>
    %22 = arith.muli %20, %21 : vector<4x512xi32>
    %c13_i32 = arith.constant 13 : i32
    %23 = vector.broadcast %c13_i32 : i32 to vector<4x512xi32>
    %24 = arith.shrsi %22, %23 : vector<4x512xi32>
    %c524287_i32 = arith.constant 524287 : i32
    %25 = vector.broadcast %c524287_i32 : i32 to vector<4x512xi32>
    %26 = arith.andi %24, %25 : vector<4x512xi32>
    %27 = arith.xori %22, %26 : vector<4x512xi32>
    %c-1028477387_i32 = arith.constant -1028477387 : i32
    %28 = vector.broadcast %c-1028477387_i32 : i32 to vector<4x512xi32>
    %29 = arith.muli %27, %28 : vector<4x512xi32>
    %c16_i32_0 = arith.constant 16 : i32
    %30 = vector.broadcast %c16_i32_0 : i32 to vector<4x512xi32>
    %31 = arith.shrsi %29, %30 : vector<4x512xi32>
    %c65535_i32_1 = arith.constant 65535 : i32
    %32 = vector.broadcast %c65535_i32_1 : i32 to vector<4x512xi32>
    %33 = arith.andi %31, %32 : vector<4x512xi32>
    %34 = arith.xori %29, %33 : vector<4x512xi32>
    %c8388607_i32 = arith.constant 8388607 : i32
    %35 = vector.broadcast %c8388607_i32 : i32 to vector<4x512xi32>
    %36 = arith.andi %34, %35 : vector<4x512xi32>
    %37 = arith.sitofp %36 : vector<4x512xi32> to vector<4x512xf32>
    %cst = arith.constant 2.38418579E-7 : f32
    %38 = vector.broadcast %cst : f32 to vector<4x512xf32>
    %39 = arith.mulf %37, %38 : vector<4x512xf32>
    %cst_2 = arith.constant -0.99999988 : f32
    %40 = vector.broadcast %cst_2 : f32 to vector<4x512xf32>
    %41 = arith.addf %39, %40 : vector<4x512xf32>
    %cst_3 = arith.constant 1.000000e+00 : f32
    %42 = vector.broadcast %cst_3 : f32 to vector<4x512xf32>
    %43 = arith.subf %42, %41 : vector<4x512xf32>
    %cst_4 = arith.constant 1.000000e+00 : f32
    %44 = vector.broadcast %cst_4 : f32 to vector<4x512xf32>
    %45 = arith.addf %44, %41 : vector<4x512xf32>
    %46 = arith.mulf %43, %45 : vector<4x512xf32>
    %47 = math.log %46 : vector<4x512xf32>
    %cst_5 = arith.constant 0.000000e+00 : f32
    %48 = vector.broadcast %cst_5 : f32 to vector<4x512xf32>
    %49 = arith.subf %48, %47 : vector<4x512xf32>
    %cst_6 = arith.constant 2.500000e+00 : f32
    %50 = vector.broadcast %cst_6 : f32 to vector<4x512xf32>
    %51 = arith.subf %49, %50 : vector<4x512xf32>
    %cst_7 = arith.constant 2.81022636E-8 : f32
    %52 = vector.broadcast %cst_7 : f32 to vector<4x512xf32>
    %53 = arith.mulf %52, %51 : vector<4x512xf32>
    %cst_8 = arith.constant 3.43273939E-7 : f32
    %54 = vector.broadcast %cst_8 : f32 to vector<4x512xf32>
    %55 = arith.addf %53, %54 : vector<4x512xf32>
    %56 = arith.mulf %55, %51 : vector<4x512xf32>
    %cst_9 = arith.constant -3.5233877E-6 : f32
    %57 = vector.broadcast %cst_9 : f32 to vector<4x512xf32>
    %58 = arith.addf %56, %57 : vector<4x512xf32>
    %59 = arith.mulf %58, %51 : vector<4x512xf32>
    %cst_10 = arith.constant -4.39150654E-6 : f32
    %60 = vector.broadcast %cst_10 : f32 to vector<4x512xf32>
    %61 = arith.addf %59, %60 : vector<4x512xf32>
    %62 = arith.mulf %61, %51 : vector<4x512xf32>
    %cst_11 = arith.constant 2.1858087E-4 : f32
    %63 = vector.broadcast %cst_11 : f32 to vector<4x512xf32>
    %64 = arith.addf %62, %63 : vector<4x512xf32>
    %65 = arith.mulf %64, %51 : vector<4x512xf32>
    %cst_12 = arith.constant -0.00125372503 : f32
    %66 = vector.broadcast %cst_12 : f32 to vector<4x512xf32>
    %67 = arith.addf %65, %66 : vector<4x512xf32>
    %68 = arith.mulf %67, %51 : vector<4x512xf32>
    %cst_13 = arith.constant -0.00417768164 : f32
    %69 = vector.broadcast %cst_13 : f32 to vector<4x512xf32>
    %70 = arith.addf %68, %69 : vector<4x512xf32>
    %71 = arith.mulf %70, %51 : vector<4x512xf32>
    %cst_14 = arith.constant 0.246640727 : f32
    %72 = vector.broadcast %cst_14 : f32 to vector<4x512xf32>
    %73 = arith.addf %71, %72 : vector<4x512xf32>
    %74 = arith.mulf %73, %51 : vector<4x512xf32>
    %cst_15 = arith.constant 1.50140941 : f32
    %75 = vector.broadcast %cst_15 : f32 to vector<4x512xf32>
    %76 = arith.addf %74, %75 : vector<4x512xf32>
    %77 = math.sqrt %49 : vector<4x512xf32>
    %cst_16 = arith.constant 3.000000e+00 : f32
    %78 = vector.broadcast %cst_16 : f32 to vector<4x512xf32>
    %79 = arith.subf %77, %78 : vector<4x512xf32>
    %cst_17 = arith.constant -2.00214257E-4 : f32
    %80 = vector.broadcast %cst_17 : f32 to vector<4x512xf32>
    %81 = arith.mulf %80, %79 : vector<4x512xf32>
    %cst_18 = arith.constant 1.00950558E-4 : f32
    %82 = vector.broadcast %cst_18 : f32 to vector<4x512xf32>
    %83 = arith.addf %81, %82 : vector<4x512xf32>
    %84 = arith.mulf %83, %79 : vector<4x512xf32>
    %cst_19 = arith.constant 0.00134934322 : f32
    %85 = vector.broadcast %cst_19 : f32 to vector<4x512xf32>
    %86 = arith.addf %84, %85 : vector<4x512xf32>
    %87 = arith.mulf %86, %79 : vector<4x512xf32>
    %cst_20 = arith.constant -0.00367342844 : f32
    %88 = vector.broadcast %cst_20 : f32 to vector<4x512xf32>
    %89 = arith.addf %87, %88 : vector<4x512xf32>
    %90 = arith.mulf %89, %79 : vector<4x512xf32>
    %cst_21 = arith.constant 0.00573950773 : f32
    %91 = vector.broadcast %cst_21 : f32 to vector<4x512xf32>
    %92 = arith.addf %90, %91 : vector<4x512xf32>
    %93 = arith.mulf %92, %79 : vector<4x512xf32>
    %cst_22 = arith.constant -0.0076224613 : f32
    %94 = vector.broadcast %cst_22 : f32 to vector<4x512xf32>
    %95 = arith.addf %93, %94 : vector<4x512xf32>
    %96 = arith.mulf %95, %79 : vector<4x512xf32>
    %cst_23 = arith.constant 0.00943887047 : f32
    %97 = vector.broadcast %cst_23 : f32 to vector<4x512xf32>
    %98 = arith.addf %96, %97 : vector<4x512xf32>
    %99 = arith.mulf %98, %79 : vector<4x512xf32>
    %cst_24 = arith.constant 1.00167406 : f32
    %100 = vector.broadcast %cst_24 : f32 to vector<4x512xf32>
    %101 = arith.addf %99, %100 : vector<4x512xf32>
    %102 = arith.mulf %101, %79 : vector<4x512xf32>
    %cst_25 = arith.constant 2.83297682 : f32
    %103 = vector.broadcast %cst_25 : f32 to vector<4x512xf32>
    %104 = arith.addf %102, %103 : vector<4x512xf32>
    %cst_26 = arith.constant 5.000000e+00 : f32
    %105 = vector.broadcast %cst_26 : f32 to vector<4x512xf32>
    %106 = arith.cmpf olt, %49, %105 : vector<4x512xf32>
    %107 = arith.select %106, %76, %104 : vector<4x512xi1>, vector<4x512xf32>
    %cst_27 = arith.constant 1.41421354 : f32
    %108 = vector.broadcast %cst_27 : f32 to vector<4x512xf32>
    %109 = arith.mulf %41, %108 : vector<4x512xf32>
    %110 = arith.mulf %107, %109 : vector<4x512xf32>
    %c0_28 = arith.constant 0 : index
    %c0_29 = arith.constant 0 : index
    %111 = vector.load %arg2[%c0_28, %c0_29] : memref<4x512xf32, #tpu.memory_space<vmem>>, vector<4x512xf32>
    tpu.vector_store %arg2[%c0_28, %c0_29], %110 {strides = array<i32>} : memref<4x512xf32, #tpu.memory_space<vmem>>, vector<4x512xf32>,
    return
  }
  func.func @transform_0(%arg0: i32, %arg1: memref<1xi32, #tpu.memory_space<smem>>) -> (i32, i32) {
    %c0_i32 = arith.constant 0 : i32
    %c0_i32_0 = arith.constant 0 : i32
    return %arg0, %c0_i32 : i32, i32
  }
}

</mosaic_0001>

<bundles_post_ra>
// kernel: tpu_custom_call.1
= control target key start
LH: loop header
LB: loop body
LE: loop exit
PB: predicated region body
PF: predicated region fallthrough
CT: control target
= control target key end

     0   :  { %7 = vsyncpa [#allocation5], 0  ;;  %v10_v0 = vlaneseq  ;;  %s572_s0 = inlined_call_operand.<no memory space> [shape: s32[1], index: 0, kind: input, shape index: {}]   ;;  %s573_s1 = inlined_call_operand.hbm [shape: f32[4,512], index: 1, kind: output, shape index: {}]  }
   0x1   :  { %s31_s8 = smul.u32 1013904223, %s572_s0  ;;  %s390_s0 = smov [#allocation4]  }
   0x2   :  { %v11_v1 = vshrl.u32 %v10_v0, 7  ;;  %v14_v2 = vand.u32 127, %v10_v0  ;;  %s321_s9 = sshll.u32 %s390_s0, 4  ;;  %s322_s9 = int_to_ptr.vmem [resolvable:$true] %s321_s9 }
   0x3   :  { %v32_v11 = vstv %s31_s8  ;;  %s366_s10 = scalar_lea.vmem %s322_s9, 256  ;;  %p371_p1 = scmp.lt.s32.totalorder %s322_s9, %s322_s9 }
   0x4   :  { %v12_v3 = vmul.u32 512, %v11_v1  ;;  %v15_v4 = vadd.s32 128, %v14_v2  ;;  %v16_v5 = vadd.s32 256, %v14_v2  ;;  %v17_v6 = vadd.s32 384, %v14_v2  ;;  %p367_p0 = scmp.ne.s32.totalorder %s322_s9, %s366_s10  ;;  %p372_p2 = scmp.lt.s32.totalorder %s366_s10, %s366_s10 }
   0x6   :  { %v18_v7 = vadd.s32 %v14_v2, %v12_v3  ;;  %v19_v8 = vadd.s32 %v15_v4, %v12_v3  ;;  %v20_v9 = vadd.s32 %v16_v5, %v12_v3  ;;  %v21_v10 = vadd.s32 %v17_v6, %v12_v3  ;;  %p373_p3 = por %p372_p2, %p371_p1 }
   0x8   :  { %v27_v12 = vmul.u32 2654435761, %v18_v7  ;;  %v28_v13 = vmul.u32 2654435761, %v19_v8  ;;  %p374_p4 = pnand %p373_p3, %p367_p0 }
   0x9   :  { %v29_v14 = vmul.u32 2654435761, %v20_v9  ;;  %v30_v15 = vmul.u32 2654435761, %v21_v10 }
   0xa   :  { %v33_v16 = vadd.s32 %v32_v11, %v27_v12  ;;  %v34_v17 = vadd.s32 %v32_v11, %v28_v13 }
   0xb   :  { %v35_v18 = vadd.s32 %v32_v11, %v29_v14  ;;  %v36_v19 = vadd.s32 %v32_v11, %v30_v15 }
   0xc   :  { %v37_v20 = vadd.s32 362437, %v33_v16  ;;  %v38_v21 = vadd.s32 362437, %v34_v17 }
   0xd   :  { %v39_v22 = vadd.s32 362437, %v35_v18  ;;  %v40_v23 = vadd.s32 362437, %v36_v19 }
   0xe   :  { %v329_v24 = vshrl.u32 %v37_v20, 16  ;;  %v330_v25 = vshrl.u32 %v38_v21, 16 }
   0xf   :  { %v331_v26 = vshrl.u32 %v39_v22, 16  ;;  %v332_v27 = vshrl.u32 %v40_v23, 16 }
  0x10   :  { %v49_v28 = vxor.u32 %v329_v24, %v37_v20  ;;  %v50_v29 = vxor.u32 %v330_v25, %v38_v21 }
  0x11   :  { %v51_v30 = vxor.u32 %v331_v26, %v39_v22  ;;  %v52_v31 = vxor.u32 %v332_v27, %v40_v23 }
  0x12   :  { %v53_v32 = vmul.u32 2246822507, %v49_v28  ;;  %v54_v33 = vmul.u32 2246822507, %v50_v29 }
  0x13   :  { %v55_v34 = vmul.u32 2246822507, %v51_v30  ;;  %v56_v35 = vmul.u32 2246822507, %v52_v31 }
  0x14   :  { %v333_v36 = vshrl.u32 %v53_v32, 13  ;;  %v334_v37 = vshrl.u32 %v54_v33, 13 }
  0x15   :  { %v335_v38 = vshrl.u32 %v55_v34, 13  ;;  %v336_v39 = vshrl.u32 %v56_v35, 13 }
  0x16   :  { %v65_v40 = vxor.u32 %v333_v36, %v53_v32  ;;  %v66_v41 = vxor.u32 %v334_v37, %v54_v33 }
  0x17   :  { %v67_v42 = vxor.u32 %v335_v38, %v55_v34  ;;  %v68_v43 = vxor.u32 %v336_v39, %v56_v35 }
  0x18   :  { %v69_v44 = vmul.u32 3266489909, %v65_v40  ;;  %v70_v45 = vmul.u32 3266489909, %v66_v41 }
  0x19   :  { %v71_v46 = vmul.u32 3266489909, %v67_v42  ;;  %v72_v47 = vmul.u32 3266489909, %v68_v43 }
  0x1a   :  { %v337_v48 = vshrl.u32 %v69_v44, 16  ;;  %v338_v49 = vshrl.u32 %v70_v45, 16 }
  0x1b   :  { %v339_v50 = vshrl.u32 %v71_v46, 16  ;;  %v340_v51 = vshrl.u32 %v72_v47, 16 }
  0x1c   :  { %v81_v52 = vxor.u32 %v337_v48, %v69_v44  ;;  %v82_v53 = vxor.u32 %v338_v49, %v70_v45 }
  0x1d   :  { %v83_v54 = vxor.u32 %v339_v50, %v71_v46  ;;  %v84_v55 = vxor.u32 %v340_v51, %v72_v47 }
  0x1e   :  { %v85_v56 = vand.u32 8388607, %v81_v52  ;;  %v86_v57 = vand.u32 8388607, %v82_v53 }
  0x1f   :  { %v87_v58 = vand.u32 8388607, %v83_v54  ;;  %v88_v59 = vand.u32 8388607, %v84_v55 }
  0x20   :  { %v89_v60 = vcvt.s32.f32 %v85_v56  ;;  %v90_v61 = vcvt.s32.f32 %v86_v57 }
  0x21   :  { %v91_v62 = vcvt.s32.f32 %v87_v58  ;;  %v92_v63 = vcvt.s32.f32 %v88_v59 }
  0x22   :  { %v93_v0 = vmul.f32 2.3841858e-07, %v89_v60  ;;  %v94_v1 = vmul.f32 2.3841858e-07, %v90_v61 }
  0x23   :  { %v95_v2 = vmul.f32 2.3841858e-07, %v91_v62  ;;  %v96_v3 = vmul.f32 2.3841858e-07, %v92_v63 }
  0x24   :  { %v404_v4 = vadd.f32 -0.9999999, %v93_v0  ;;  %v406_v5 = vadd.f32 -0.9999999, %v94_v1 }
  0x25   :  { %v408_v6 = vadd.f32 -0.9999999, %v95_v2  ;;  %v410_v7 = vadd.f32 -0.9999999, %v96_v3 }
  0x26   :  { %v101_v8 = vsub.f32 1.0, %v404_v4  ;;  %v102_v9 = vsub.f32 1.0, %v406_v5  ;;  %v105_v10 = vadd.f32 1.0, %v404_v4  ;;  %v106_v11 = vadd.f32 1.0, %v406_v5 }
  0x27   :  { %v103_v12 = vsub.f32 1.0, %v408_v6  ;;  %v104_v13 = vsub.f32 1.0, %v410_v7  ;;  %v107_v14 = vadd.f32 1.0, %v408_v6  ;;  %v108_v15 = vadd.f32 1.0, %v410_v7 }
  0x28   :  { %v109_v16 = vmul.f32 %v105_v10, %v101_v8  ;;  %v110_v17 = vmul.f32 %v106_v11, %v102_v9 }
  0x29   :  { %v111_v18 = vmul.f32 %v107_v14, %v103_v12  ;;  %v112_v19 = vmul.f32 %v108_v15, %v104_v13 }
  0x2a   :  { %350 = vlog2.f32 %v109_v16 }
  0x2b   :  { %352 = vlog2.f32 %v110_v17 }
  0x2c   :  { %354 = vlog2.f32 %v111_v18 }
  0x2d   :  { %356 = vlog2.f32 %v112_v19 }
  0x34   :  { %v351_v20 = vpop.eup %350 }
  0x35   :  { %v353_v21 = vpop.eup %352  ;;  %v114_v22 = vmul.f32 0.6931472, %v351_v20 }
  0x36   :  { %v355_v23 = vpop.eup %354  ;;  %v116_v24 = vmul.f32 0.6931472, %v353_v21 }
  0x37   :  { %v357_v25 = vpop.eup %356  ;;  %v118_v26 = vmul.f32 0.6931472, %v355_v23  ;;  %v420_v27 = vsub.f32 0.0, %v114_v22 }
  0x38   :  { %v120_v28 = vmul.f32 0.6931472, %v357_v25  ;;  %v422_v29 = vsub.f32 0.0, %v116_v24 }
  0x39   :  { %v424_v30 = vsub.f32 0.0, %v118_v26  ;;  %v427_v31 = vadd.f32 -2.5, %v420_v27  ;;  %358 = vrsqrt.f32 %v420_v27  ;;  %vm195_vm0 = vcmp.eq.f32.partialorder %v420_v27, inf }
  0x3a   :  { %v430_v32 = vsub.f32 0.0, %v120_v28  ;;  %v433_v33 = vadd.f32 -2.5, %v422_v29  ;;  %360 = vrsqrt.f32 %v422_v29  ;;  %vm197_vm1 = vcmp.eq.f32.partialorder %v420_v27, 0.0 }
  0x3b   :  { %v436_v34 = vadd.f32 -2.5, %v424_v30  ;;  %v129_v35 = vmul.f32 2.8102264e-08, %v427_v31  ;;  %362 = vrsqrt.f32 %v424_v30  ;;  %v198_v48 = vand.u32 2147483648, %v420_v27 }
  0x3c   :  { %v441_v36 = vadd.f32 -2.5, %v430_v32  ;;  %v130_v37 = vmul.f32 2.8102264e-08, %v433_v33  ;;  %364 = vrsqrt.f32 %v430_v32  ;;  %vm202_vm2 = vcmp.eq.f32.partialorder %v422_v29, inf }
  0x3d   :  { %v131_v38 = vmul.f32 2.8102264e-08, %v436_v34  ;;  %v133_v39 = vadd.f32 3.4327394e-07, %v129_v35  ;;  %vm204_vm3 = vcmp.eq.f32.partialorder %v422_v29, 0.0  ;;  %v205_v51 = vand.u32 2147483648, %v422_v29 }
  0x3e   :  { %v132_v40 = vmul.f32 2.8102264e-08, %v441_v36  ;;  %v134_v41 = vadd.f32 3.4327394e-07, %v130_v37  ;;  %vm209_vm4 = vcmp.eq.f32.partialorder %v424_v30, inf  ;;  %vm211_vm5 = vcmp.eq.f32.partialorder %v424_v30, 0.0 }
  0x3f   :  { %v135_v42 = vadd.f32 3.4327394e-07, %v131_v38  ;;  %v137_v43 = vmul.f32 %v427_v31, %v133_v39  ;;  %v212_v58 = vand.u32 2147483648, %v424_v30  ;;  %vm216_vm6 = vcmp.eq.f32.partialorder %v430_v32, inf }
  0x40   :  { %v136_v44 = vadd.f32 3.4327394e-07, %v132_v40  ;;  %v138_v45 = vmul.f32 %v433_v33, %v134_v41  ;;  %vm218_vm7 = vcmp.eq.f32.partialorder %v430_v32, 0.0  ;;  %v219_v10 = vand.u32 2147483648, %v430_v32 }
  0x41   :  { %v139_v46 = vmul.f32 %v436_v34, %v135_v42  ;;  %v141_v47 = vadd.f32 -3.5233877e-06, %v137_v43  ;;  %vm289_vm8 = vcmp.lt.f32.partialorder %v420_v27, 5.0  ;;  %vm290_vm9 = vcmp.lt.f32.partialorder %v422_v29, 5.0 }
  0x42   :  { %v140_v49 = vmul.f32 %v441_v36, %v136_v44  ;;  %v142_v50 = vadd.f32 -3.5233877e-06, %v138_v45  ;;  %vm291_vm10 = vcmp.lt.f32.partialorder %v424_v30, 5.0  ;;  %vm292_vm11 = vcmp.lt.f32.partialorder %v430_v32, 5.0 }
  0x43   :  { %v359_v52 = vpop.eup %358  ;;  %v143_v53 = vadd.f32 -3.5233877e-06, %v139_v46  ;;  %v145_v54 = vmul.f32 %v427_v31, %v141_v47 }
  0x44   :  { %v144_v55 = vadd.f32 -3.5233877e-06, %v140_v49  ;;  %v146_v56 = vmul.f32 %v433_v33, %v142_v50  ;;  %v194_v57 = vmul.f32 %v359_v52, %v420_v27  ;;  %v361_v59 = vpop.eup %360 }
  0x45   :  { %v147_v60 = vmul.f32 %v436_v34, %v143_v53  ;;  %v149_v61 = vadd.f32 -4.3915065e-06, %v145_v54  ;;  %v201_v1 = vmul.f32 %v361_v59, %v422_v29  ;;  %v363_v2 = vpop.eup %362 }
  0x46   :  { %v148_v62 = vmul.f32 %v441_v36, %v144_v55  ;;  %v150_v63 = vadd.f32 -4.3915065e-06, %v146_v56  ;;  %v196_v0 = vsel %vm195_vm0, %v420_v27, %v194_v57  ;;  %v208_v14 = vmul.f32 %v363_v2, %v424_v30  ;;  %v365_v15 = vpop.eup %364 }
  0x47   :  { %v151_v3 = vadd.f32 -4.3915065e-06, %v147_v60  ;;  %v153_v8 = vmul.f32 %v427_v31, %v149_v61  ;;  %v199_v9 = vsel %vm197_vm1, %v198_v48, %v196_v0  ;;  %v203_v13 = vsel %vm202_vm2, %v422_v29, %v201_v1 }
  0x48   :  { %v152_v11 = vadd.f32 -4.3915065e-06, %v148_v62  ;;  %v154_v12 = vmul.f32 %v433_v33, %v150_v63  ;;  %v206_v18 = vsel %vm204_vm3, %v205_v51, %v203_v13  ;;  %v484_v19 = vadd.f32 -3.0, %v199_v9 }
  0x49   :  { %v155_v16 = vmul.f32 %v436_v34, %v151_v3  ;;  %v157_v17 = vadd.f32 0.00021858087, %v153_v8  ;;  %v210_v22 = vsel %vm209_vm4, %v424_v30, %v208_v14  ;;  %v215_v23 = vmul.f32 %v365_v15, %v430_v32 }
  0x4a   :  { %v156_v20 = vmul.f32 %v441_v36, %v152_v11  ;;  %v158_v21 = vadd.f32 0.00021858087, %v154_v12  ;;  %v213_v25 = vsel %vm211_vm5, %v212_v58, %v210_v22  ;;  %v493_v26 = vadd.f32 -3.0, %v206_v18 }
  0x4b   :  { %v159_v24 = vadd.f32 0.00021858087, %v155_v16  ;;  %v217_v35 = vsel %vm216_vm6, %v430_v32, %v215_v23  ;;  %v498_v37 = vadd.f32 -3.0, %v213_v25  ;;  %v161_v38 = vmul.f32 %v427_v31, %v157_v17 }
  0x4c   :  { %v160_v28 = vadd.f32 0.00021858087, %v156_v20  ;;  %v220_v39 = vsel %vm218_vm7, %v219_v10, %v217_v35  ;;  %v225_v40 = vmul.f32 -0.00020021426, %v484_v19  ;;  %v162_v41 = vmul.f32 %v433_v33, %v158_v21 }
  0x4d   :  { %v505_v42 = vadd.f32 -3.0, %v220_v39  ;;  %v226_v43 = vmul.f32 -0.00020021426, %v493_v26  ;;  %v163_v44 = vmul.f32 %v436_v34, %v159_v24  ;;  %v227_v45 = vmul.f32 -0.00020021426, %v498_v37 }
  0x4e   :  { %v229_v46 = vadd.f32 0.00010095056, %v225_v40  ;;  %v164_v47 = vmul.f32 %v441_v36, %v160_v28  ;;  %v165_v50 = vadd.f32 -0.001253725, %v161_v38  ;;  %v166_v53 = vadd.f32 -0.001253725, %v162_v41 }
  0x4f   :  { %v228_v48 = vmul.f32 -0.00020021426, %v505_v42  ;;  %v230_v49 = vadd.f32 0.00010095056, %v226_v43  ;;  %v231_v51 = vadd.f32 0.00010095056, %v227_v45 }
  0x50   :  { %v233_v52 = vmul.f32 %v484_v19, %v229_v46  ;;  %v167_v56 = vadd.f32 -0.001253725, %v163_v44  ;;  %v168_v59 = vadd.f32 -0.001253725, %v164_v47  ;;  %v169_v62 = vmul.f32 %v427_v31, %v165_v50 }
  0x51   :  { %v232_v54 = vadd.f32 0.00010095056, %v228_v48  ;;  %v234_v55 = vmul.f32 %v493_v26, %v230_v49  ;;  %v235_v57 = vmul.f32 %v498_v37, %v231_v51  ;;  %v170_v1 = vmul.f32 %v433_v33, %v166_v53 }
  0x52   :  { %v237_v58 = vadd.f32 0.0013493432, %v233_v52  ;;  %v171_v8 = vmul.f32 %v436_v34, %v167_v56  ;;  %v172_v11 = vmul.f32 %v441_v36, %v168_v59  ;;  %v173_v14 = vadd.f32 -0.0041776816, %v169_v62 }
  0x53   :  { %v236_v60 = vmul.f32 %v505_v42, %v232_v54  ;;  %v238_v61 = vadd.f32 0.0013493432, %v234_v55  ;;  %v239_v63 = vadd.f32 0.0013493432, %v235_v57  ;;  %v174_v17 = vadd.f32 -0.0041776816, %v170_v1 }
  0x54   :  { %v241_v0 = vmul.f32 %v484_v19, %v237_v58  ;;  %v175_v21 = vadd.f32 -0.0041776816, %v171_v8  ;;  %v176_v24 = vadd.f32 -0.0041776816, %v172_v11  ;;  %v177_v35 = vmul.f32 %v427_v31, %v173_v14 }
  0x55   :  { %v240_v2 = vadd.f32 0.0013493432, %v236_v60  ;;  %v242_v3 = vmul.f32 %v493_v26, %v238_v61  ;;  %v243_v9 = vmul.f32 %v498_v37, %v239_v63  ;;  %v178_v40 = vmul.f32 %v433_v33, %v174_v17 }
  0x56   :  { %v245_v10 = vadd.f32 -0.0036734284, %v241_v0  ;;  %v179_v44 = vmul.f32 %v436_v34, %v175_v21  ;;  %v180_v47 = vmul.f32 %v441_v36, %v176_v24  ;;  %v181_v50 = vadd.f32 0.24664073, %v177_v35 }
  0x57   :  { %v244_v12 = vmul.f32 %v505_v42, %v240_v2  ;;  %v246_v13 = vadd.f32 -0.0036734284, %v242_v3  ;;  %v247_v15 = vadd.f32 -0.0036734284, %v243_v9  ;;  %v182_v53 = vadd.f32 0.24664073, %v178_v40 }
  0x58   :  { %v249_v16 = vmul.f32 %v484_v19, %v245_v10  ;;  %v183_v56 = vadd.f32 0.24664073, %v179_v44  ;;  %v184_v59 = vadd.f32 0.24664073, %v180_v47  ;;  %v185_v62 = vmul.f32 %v427_v31, %v181_v50 }
  0x59   :  { %v248_v18 = vadd.f32 -0.0036734284, %v244_v12  ;;  %v250_v20 = vmul.f32 %v493_v26, %v246_v13  ;;  %v251_v22 = vmul.f32 %v498_v37, %v247_v15  ;;  %v186_v1 = vmul.f32 %v433_v33, %v182_v53 }
  0x5a   :  { %v253_v23 = vadd.f32 0.0057395077, %v249_v16  ;;  %v187_v8 = vmul.f32 %v436_v34, %v183_v56  ;;  %v297_v11 = vmul.f32 1.4142135, %v404_v4  ;;  %v188_v12 = vmul.f32 %v441_v36, %v184_v59 }
  0x5b   :  { %v252_v25 = vmul.f32 %v505_v42, %v248_v18  ;;  %v254_v28 = vadd.f32 0.0057395077, %v250_v20  ;;  %v255_v38 = vadd.f32 0.0057395077, %v251_v22  ;;  %v298_v14 = vmul.f32 1.4142135, %v406_v5 }
  0x5c   :  { %v257_v39 = vmul.f32 %v484_v19, %v253_v23  ;;  %v189_v15 = vadd.f32 1.5014094, %v185_v62  ;;  %v299_v17 = vmul.f32 1.4142135, %v408_v6  ;;  %v190_v18 = vadd.f32 1.5014094, %v186_v1 }
  0x5d   :  { %v256_v41 = vadd.f32 0.0057395077, %v252_v25  ;;  %v258_v43 = vmul.f32 %v493_v26, %v254_v28  ;;  %v259_v45 = vmul.f32 %v498_v37, %v255_v38  ;;  %v191_v4 = vadd.f32 1.5014094, %v187_v8 }
  0x5e   :  { %v261_v46 = vadd.f32 -0.0076224613, %v257_v39  ;;  %v192_v22 = vadd.f32 1.5014094, %v188_v12 }
  0x5f   :  { %v260_v48 = vmul.f32 %v505_v42, %v256_v41  ;;  %v262_v49 = vadd.f32 -0.0076224613, %v258_v43  ;;  %v263_v51 = vadd.f32 -0.0076224613, %v259_v45 }
  0x60   :  { %v265_v52 = vmul.f32 %v484_v19, %v261_v46 }
  0x61   :  { %v264_v54 = vadd.f32 -0.0076224613, %v260_v48  ;;  %v266_v55 = vmul.f32 %v493_v26, %v262_v49  ;;  %v267_v57 = vmul.f32 %v498_v37, %v263_v51 }
  0x62   :  { %v269_v58 = vadd.f32 0.0094388705, %v265_v52 }
  0x63   :  { %v268_v60 = vmul.f32 %v505_v42, %v264_v54  ;;  %v270_v61 = vadd.f32 0.0094388705, %v266_v55  ;;  %v271_v63 = vadd.f32 0.0094388705, %v267_v57 }
  0x64   :  { %v273_v0 = vmul.f32 %v484_v19, %v269_v58 }
  0x65   :  { %v272_v2 = vadd.f32 0.0094388705, %v268_v60  ;;  %v274_v3 = vmul.f32 %v493_v26, %v270_v61  ;;  %v275_v9 = vmul.f32 %v498_v37, %v271_v63 }
  0x66   :  { %v277_v10 = vadd.f32 1.001674, %v273_v0 }
  0x67   :  { %v276_v13 = vmul.f32 %v505_v42, %v272_v2  ;;  %v278_v31 = vadd.f32 1.001674, %v274_v3  ;;  %v279_v16 = vadd.f32 1.001674, %v275_v9 }
  0x68   :  { %v281_v33 = vmul.f32 %v484_v19, %v277_v10 }
  0x69   :  { %v280_v34 = vadd.f32 1.001674, %v276_v13  ;;  %v282_v20 = vmul.f32 %v493_v26, %v278_v31  ;;  %v283_v36 = vmul.f32 %v498_v37, %v279_v16  ;;  %v300_v26 = vmul.f32 1.4142135, %v410_v7 }
  0x6a   :  { %v285_v21 = vadd.f32 2.8329768, %v281_v33 }
  0x6b   :  { %v284_v5 = vmul.f32 %v505_v42, %v280_v34  ;;  %v286_v23 = vadd.f32 2.8329768, %v282_v20  ;;  %v287_v19 = vadd.f32 2.8329768, %v283_v36 }
  0x6c   :  { %v293_v6 = vsel %vm289_vm8, %v189_v15, %v285_v21 }
  0x6d   :  { %v288_v24 = vadd.f32 2.8329768, %v284_v5  ;;  %v294_v27 = vsel %vm290_vm9, %v190_v18, %v286_v23  ;;  %v301_v25 = vmul.f32 %v297_v11, %v293_v6  ;;  %v295_v28 = vsel %vm291_vm10, %v191_v4, %v287_v19 }
  0x6e   :  { %v302_v37 = vmul.f32 %v298_v14, %v294_v27  ;;  %v303_v38 = vmul.f32 %v299_v17, %v295_v28 }
  0x6f   :  { %v296_v35 = vsel %vm292_vm11, %v192_v22, %v288_v24 }
  0x70   :  { %v304_v29 = vmul.f32 %v300_v26, %v296_v35  ;;  %v309_v42 = vcombine.low %v301_v25, %v302_v37 }
  0x72   :  { %v310_v39 = vcombine.low %v303_v38, %v304_v29  ;;  %313 = vst [vmem:[#allocation4] sm:$0xff] %v309_v42 }
  0x74   :  { %314 = vst [vmem:[#allocation4 + $0x8] sm:$0xff] %v310_v39 }
  0x75   :  { %377 = shalt.err (!%p374_p4)
}
  0x76   :  { %s378_s13 = scalar_lea.hbm %s573_s1, 256 }
  0x77   :  { %p379_p5 = scmp.ne.s32.totalorder %s573_s1, %s378_s13  ;;  %p382_p6 = scmp.lt.u32.totalorder %s378_s13, %s573_s1 }
  0x79   :  { %p384_p7 = pnand %p382_p6, %p379_p5 }
  0x7b   :  { %387 = shalt.err (!%p384_p7)
}
  0x7c   :  { %324 = dma.vmem_to_hbm [thread:$0]  %s322_s9, 256, %s573_s1, [#allocation5]  }
  0x7d   :  { %388 = dma.done.wait [#allocation5], 256  }
  0x7e   :  { %389 = vsyncadd [#allocation5], 4294967040 }
  0x7f   :  { %328 = vsyncpa [#allocation5], 1 }

</bundles_post_ra>
